<compile_context>
chip_gen: v7x
topology: tpu7x:2x2x1
jax: 0.10.0
libtpu: 0.0.40
codegen_flags: <defaults>
</compile_context>

<pallas_src>
import jax
import jax.numpy as jnp
from jax.experimental import pallas as pl
from jax.experimental.pallas import tpu as pltpu

H1, H2 = 40, 20  # logical hidden widths of the PyTorch module
HP = 128         # padded lane width used for both hidden layers


def _sigmoid(x):
    # Exactly the logistic function, but one EUP push (tanh) per element.
    return 0.5 * (jnp.tanh(0.5 * x) + 1.0)


def mlp_kernel(x_ref, w1_ref, b1_ref, w2_ref, b2_ref, w3_ref, b3_ref, o_ref, acc_ref):
    """Grid = (batch_tiles, k_tiles).  Layer-1 accumulates over k; epilogue on last k."""
    k = pl.program_id(1)

    @pl.when(k == 0)
    def _():
        acc_ref[...] = jnp.zeros_like(acc_ref)

    # Layer 1 partial product on the MXU (bf16 or f32 inputs, f32 accumulation).
    acc_ref[...] += jnp.dot(x_ref[...], w1_ref[...], preferred_element_type=jnp.float32)

    @pl.when(k == pl.num_programs(1) - 1)
    def _():
        # Padded h1/h2 lanes come out as sigmoid(0)=0.5 but hit zero weight rows/cols,
        # so the result is exact.
        h1 = _sigmoid(acc_ref[...] + b1_ref[...])                      # (block_b, 128) f32
        h2 = _sigmoid(
            jnp.dot(h1.astype(w2_ref.dtype), w2_ref[...],
                    preferred_element_type=jnp.float32) + b2_ref[...])  # (block_b, 128) f32
        # Layer 3: contract w3's 128-wide feature dim (real weights in row 0 of the (8,128)
        # tile) against h2's feature dim -> (8, block_b); row 0 is already lane-dense.
        z = jax.lax.dot_general(
            w3_ref[...], h2.astype(w3_ref.dtype),
            dimension_numbers=(((1,), (1,)), ((), ())),
            preferred_element_type=jnp.float32,
        )[0:1, :]                                                       # (1, block_b)
        o_ref[...] = _sigmoid(z + b3_ref[...]).astype(o_ref.dtype)


def _pad2d(a, rows, cols):
    a = jnp.asarray(a, jnp.float32)
    r, c = a.shape
    return jnp.pad(a, ((0, rows - r), (0, cols - c)))


def _prepare_params(params, dim_pad, w_dtype):
    w1 = _pad2d(params["w1"], dim_pad, HP).astype(w_dtype)   # (dim_pad, 128)
    b1 = _pad2d(params["b1"], 1, HP)                          # (1, 128) f32
    w2 = _pad2d(params["w2"], HP, HP).astype(w_dtype)         # (128, 128)
    b2 = _pad2d(params["b2"], 1, HP)                          # (1, 128) f32
    # w3 is (20, 1); store it transposed as an (8, 128) tile with real weights in row 0.
    w3 = _pad2d(jnp.asarray(params["w3"], jnp.float32).T, 8, HP).astype(w_dtype)
    b3 = jnp.asarray(params["b3"], jnp.float32).reshape(1, 1)
    return w1, b1, w2, b2, w3, b3


def _round_up(n, m):
    return ((n + m - 1) // m) * m


def _vmem_capacity_bytes():
    try:
        cap = getattr(pltpu.get_tpu_info(), "vmem_capacity_bytes", None)
        if cap:
            return int(cap)
    except Exception:
        pass
    return 64 << 20  # conservative (v7x-sized) fallback


def dis_three_linear(x, params, *, use_bf16=True, block_b=None, block_k=None):
    """x: (B, dim). params: dict of w1,b1,w2,b2,w3,b3 with weights in (in, out) layout."""
    B, dim = x.shape
    stream_dtype = jnp.bfloat16 if use_bf16 else jnp.float32
    x = x.astype(stream_dtype)
    itx = jnp.dtype(stream_dtype).itemsize
    itw = itx

    # Generation-aware VMEM budget: ~96 MiB on 128-MiB-VMEM parts (v5e/v6e), <=56 MiB on v7x.
    phys_vmem = _vmem_capacity_bytes()
    vmem_cap = (96 << 20) if phys_vmem >= (100 << 20) else (56 << 20)

    # --- K tiling over dim (decouples VMEM use from dim) --------------------------------
    if block_k is None:
        tk = dim if dim <= 2048 else 2048
    else:
        tk = max(128, (int(block_k) // 128) * 128)
        tk = min(tk, _round_up(dim, 128))
    num_k = int(pl.cdiv(dim, tk))
    dim_pad = num_k * tk

    # --- batch tile from the VMEM byte budget --------------------------------------------
    # Fixed (batch-independent) residents: double-buffered w1 tile + w2/b1/b2/w3/b3 copies.
    fixed_bytes = 2 * (tk * HP * itw + HP * HP * itw + 2 * HP * 4 + 8 * HP * itw + 4)
    # Per batch-row: double-buffered x tile + f32 accumulator + epilogue temporaries + out.
    per_row = 2 * tk * itx + 7 * HP * 4 + 16
    budget = max(vmem_cap - fixed_bytes - (8 << 20), 1 << 20)
    auto_b = max(128, min((budget // per_row) // 128 * 128, 8192))
    if block_b is not None:
        auto_b = max(128, (int(block_b) // 128) * 128)
    block_b = min(auto_b, _round_up(B, 128))
    if B > 128:
        # Keep >= 2 batch tiles so both v7x TensorCores get work on the "parallel" axis.
        block_b = min(block_b, max(128, ((B - 1) // 128) * 128))

    num_blocks = int(pl.cdiv(B, block_b))
    B_pad = num_blocks * block_b

    # Zero-pad batch and feature dims (exact: padded features hit zero weight rows).
    if (B_pad - B) or (dim_pad - dim):
        x = jnp.pad(x, ((0, B_pad - B), (0, dim_pad - dim)))
    w1, b1, w2, b2, w3, b3 = _prepare_params(params, dim_pad, stream_dtype)

    vmem_est = fixed_bytes + block_b * per_row + (4 << 20)
    vmem_limit = int(min(max(vmem_est, 32 << 20), vmem_cap))

    cost = pl.CostEstimate(
        flops=int(2 * B_pad * (dim_pad * HP + HP * HP + HP)),
        transcendentals=int(B_pad * (H1 + H2 + 1)),   # useful lanes only
        bytes_accessed=int(B_pad * dim_pad * itx
                           + (dim_pad * HP + HP * HP + 8 * HP) * itw
                           + 3 * HP * 4 + 4
                           + B_pad * 4),
    )

    def const(shape):
        return pl.BlockSpec(shape, lambda i, k: (0,) * len(shape))

    out_row = pl.pallas_call(
        mlp_kernel,
        out_shape=jax.ShapeDtypeStruct((1, B_pad), jnp.float32),
        grid_spec=pltpu.PrefetchScalarGridSpec(
            num_scalar_prefetch=0,
            grid=(num_blocks, num_k),
            in_specs=[
                pl.BlockSpec((block_b, tk), lambda i, k: (i, k)),   # streamed x tile
                pl.BlockSpec((tk, HP), lambda i, k: (k, 0)),        # w1 K-tile
                const((1, HP)),                                     # b1
                const((HP, HP)), const((1, HP)),                    # layer 2 (padded)
                const((8, HP)), const((1, 1)),                      # layer 3
            ],
            # Lane-dense output: one (1, block_b) row per batch tile, written on the last k.
            out_specs=pl.BlockSpec((1, block_b), lambda i, k: (0, i)),
            scratch_shapes=[pltpu.VMEM((block_b, HP), jnp.float32)],  # layer-1 accumulator
        ),
        compiler_params=pltpu.CompilerParams(
            dimension_semantics=("parallel", "arbitrary"),
            vmem_limit_bytes=vmem_limit,
        ),
        cost_estimate=cost,
    )(x, w1, b1, w2, b2, w3, b3)

    return out_row[0, :B].reshape(B, 1)


def init_params(dim, key):
    """Deterministic synthetic init (PyTorch nn.Linear-style uniform bounds)."""
    ks = jax.random.split(key, 6)

    def linear(kw, kb, fan_in, fan_out):
        bound = 1.0 / jnp.sqrt(fan_in)
        w = jax.random.uniform(kw, (fan_in, fan_out), jnp.float32, -bound, bound)
        b = jax.random.uniform(kb, (1, fan_out), jnp.float32, -bound, bound)
        return w, b

    w1, b1 = linear(ks[0], ks[1], dim, H1)
    w2, b2 = linear(ks[2], ks[3], H1, H2)
    w3, b3 = linear(ks[4], ks[5], H2, 1)
    return {"w1": w1, "b1": b1, "w2": w2, "b2": b2, "w3": w3, "b3": b3}


def reference(x, p):
    h1 = jax.nn.sigmoid(x @ p["w1"] + p["b1"])
    h2 = jax.nn.sigmoid(h1 @ p["w2"] + p["b2"])
    return jax.nn.sigmoid(h2 @ p["w3"] + p["b3"])


if __name__ == "__main__":
    key = jax.random.PRNGKey(0)
    kx, kp = jax.random.split(key)

    B, dim = 16, 32
    x = jax.random.normal(kx, (B, dim), jnp.float32)
    params = init_params(dim, kp)
    ref = reference(x, params)

    # Default fast path: bf16 streaming of x / weights, f32 accumulation.
    out = jax.block_until_ready(dis_three_linear(x, params))
    assert out.shape == (B, 1), out.shape
    assert jnp.allclose(out, ref, atol=2e-2), float(jnp.max(jnp.abs(out - ref)))

    # Exact f32 path — bit-for-bit parity with the f32 reference math.
    out_f32 = jax.block_until_ready(dis_three_linear(x, params, use_bf16=False))
    assert jnp.allclose(out_f32, ref, atol=1e-5, rtol=1e-5), \
        float(jnp.max(jnp.abs(out_f32 - ref)))

    # Tail padding + multi batch-tile + K-tiled (num_k > 1) accumulator path.
    B2, dim2 = 300, 256
    x2 = jax.random.normal(jax.random.PRNGKey(1), (B2, dim2), jnp.float32)
    params2 = init_params(dim2, jax.random.PRNGKey(2))
    out2 = jax.block_until_ready(
        dis_three_linear(x2, params2, use_bf16=False, block_b=128, block_k=128))
    ref2 = reference(x2, params2)
    assert out2.shape == (B2, 1), out2.shape
    assert jnp.allclose(out2, ref2, atol=1e-4, rtol=1e-4), \
        float(jnp.max(jnp.abs(out2 - ref2)))

    print("KERNEL_OK")
</pallas_src>

<mosaic_0001>
module attributes {stable_mosaic.version = 11 : i64} {
  func.func @mlp_kernel(%arg0: i32, %arg1: i32, %arg2: memref<128x32xbf16, #tpu.memory_space<vmem>>, %arg3: memref<32x128xbf16, #tpu.memory_space<vmem>>, %arg4: memref<1x128xf32, #tpu.memory_space<vmem>>, %arg5: memref<128x128xbf16, #tpu.memory_space<vmem>>, %arg6: memref<1x128xf32, #tpu.memory_space<vmem>>, %arg7: memref<8x128xbf16, #tpu.memory_space<vmem>>, %arg8: memref<1x1xf32, #tpu.memory_space<vmem>>, %arg9: memref<1x128xf32, #tpu.memory_space<vmem>>, %arg10: memref<128x128xf32, #tpu.memory_space<vmem>>) attributes {dimension_semantics = [#tpu.dimension_semantics<parallel>, #tpu.dimension_semantics<arbitrary>], iteration_bounds = array<i64: 1, 1>, scalar_prefetch = 0 : i64, scratch_operands = 1 : i64, tpu.core_type = #tpu.core_type<tc>, window_params = [{transform_indices = @transform_0, window_bounds = array<i64: 128, 32>}, {transform_indices = @transform_1, window_bounds = array<i64: 32, 128>}, {pipeline_mode = #tpu.pipeline_mode<synchronous>, transform_indices = @transform_2, window_bounds = array<i64: 1, 128>}, {pipeline_mode = #tpu.pipeline_mode<synchronous>, transform_indices = @transform_3, window_bounds = array<i64: 128, 128>}, {pipeline_mode = #tpu.pipeline_mode<synchronous>, transform_indices = @transform_4, window_bounds = array<i64: 1, 128>}, {pipeline_mode = #tpu.pipeline_mode<synchronous>, transform_indices = @transform_5, window_bounds = array<i64: 8, 128>}, {pipeline_mode = #tpu.pipeline_mode<synchronous>, transform_indices = @transform_6, window_bounds = array<i64: 1, 1>}, {transform_indices = @transform_7, window_bounds = array<i64: 1, 128>}]} {
    %c0_i32 = arith.constant 0 : i32
    %0 = arith.cmpi eq, %arg1, %c0_i32 : i32
    %1 = arith.extui %0 : i1 to i32
    %c0_i32_0 = arith.constant 0 : i32
    %2 = arith.cmpi ne, %1, %c0_i32_0 : i32
    scf.if %2 {
      %cst_10 = arith.constant 0.000000e+00 : f32
      %12 = vector.broadcast %cst_10 : f32 to vector<128x128xf32>
      %c0_11 = arith.constant 0 : index
      %c0_12 = arith.constant 0 : index
      %13 = vector.load %arg10[%c0_11, %c0_12] : memref<128x128xf32, #tpu.memory_space<vmem>>, vector<128x128xf32>
      tpu.vector_store %arg10[%c0_11, %c0_12], %12 {strides = array<i32>} : memref<128x128xf32, #tpu.memory_space<vmem>>, vector<128x128xf32>,
    } else {
    }
    %c0 = arith.constant 0 : index
    %c0_1 = arith.constant 0 : index
    %3 = vector.load %arg10[%c0, %c0_1] : memref<128x128xf32, #tpu.memory_space<vmem>>, vector<128x128xf32>
    %c0_2 = arith.constant 0 : index
    %c0_3 = arith.constant 0 : index
    %4 = vector.load %arg2[%c0_2, %c0_3] : memref<128x32xbf16, #tpu.memory_space<vmem>>, vector<128x32xbf16>
    %c0_4 = arith.constant 0 : index
    %c0_5 = arith.constant 0 : index
    %5 = vector.load %arg3[%c0_4, %c0_5] : memref<32x128xbf16, #tpu.memory_space<vmem>>, vector<32x128xbf16>
    %cst = arith.constant dense<0.000000e+00> : vector<128x128xf32>
    %6 = tpu.matmul %4, %5, %cst {dimension_numbers = #tpu.dot_dimension_numbers<[1], [0], [0], [1], [0, 0, 1, 1], [], []>} : vector<128x32xbf16>, vector<32x128xbf16>, vector<128x128xf32> -> vector<128x128xf32>
    %7 = arith.addf %3, %6 : vector<128x128xf32>
    %c0_6 = arith.constant 0 : index
    %c0_7 = arith.constant 0 : index
    %8 = vector.load %arg10[%c0_6, %c0_7] : memref<128x128xf32, #tpu.memory_space<vmem>>, vector<128x128xf32>
    tpu.vector_store %arg10[%c0_6, %c0_7], %7 {strides = array<i32>} : memref<128x128xf32, #tpu.memory_space<vmem>>, vector<128x128xf32>,
    %c0_i32_8 = arith.constant 0 : i32
    %9 = arith.cmpi eq, %arg1, %c0_i32_8 : i32
    %10 = arith.extui %9 : i1 to i32
    %c0_i32_9 = arith.constant 0 : i32
    %11 = arith.cmpi ne, %10, %c0_i32_9 : i32
    scf.if %11 {
      %c0_10 = arith.constant 0 : index
      %c0_11 = arith.constant 0 : index
      %12 = vector.load %arg10[%c0_10, %c0_11] : memref<128x128xf32, #tpu.memory_space<vmem>>, vector<128x128xf32>
      %c0_12 = arith.constant 0 : index
      %c0_13 = arith.constant 0 : index
      %13 = vector.load %arg4[%c0_12, %c0_13] : memref<1x128xf32, #tpu.memory_space<vmem>>, vector<1x128xf32>
      %14 = vector.broadcast %13 : vector<1x128xf32> to vector<128x128xf32>
      %15 = arith.addf %12, %14 : vector<128x128xf32>
      %cst_14 = arith.constant 5.000000e-01 : f32
      %16 = vector.broadcast %cst_14 : f32 to vector<128x128xf32>
      %17 = arith.mulf %16, %15 : vector<128x128xf32>
      %18 = math.tanh %17 : vector<128x128xf32>
      %cst_15 = arith.constant 1.000000e+00 : f32
      %19 = vector.broadcast %cst_15 : f32 to vector<128x128xf32>
      %20 = arith.addf %18, %19 : vector<128x128xf32>
      %cst_16 = arith.constant 5.000000e-01 : f32
      %21 = vector.broadcast %cst_16 : f32 to vector<128x128xf32>
      %22 = arith.mulf %21, %20 : vector<128x128xf32>
      %23 = arith.truncf %22 : vector<128x128xf32> to vector<128x128xbf16>
      %c0_17 = arith.constant 0 : index
      %c0_18 = arith.constant 0 : index
      %24 = vector.load %arg5[%c0_17, %c0_18] : memref<128x128xbf16, #tpu.memory_space<vmem>>, vector<128x128xbf16>
      %cst_19 = arith.constant dense<0.000000e+00> : vector<128x128xf32>
      %25 = tpu.matmul %23, %24, %cst_19 {dimension_numbers = #tpu.dot_dimension_numbers<[1], [0], [0], [1], [0, 0, 1, 1], [], []>} : vector<128x128xbf16>, vector<128x128xbf16>, vector<128x128xf32> -> vector<128x128xf32>
      %c0_20 = arith.constant 0 : index
      %c0_21 = arith.constant 0 : index
      %26 = vector.load %arg6[%c0_20, %c0_21] : memref<1x128xf32, #tpu.memory_space<vmem>>, vector<1x128xf32>
      %27 = vector.broadcast %26 : vector<1x128xf32> to vector<128x128xf32>
      %28 = arith.addf %25, %27 : vector<128x128xf32>
      %cst_22 = arith.constant 5.000000e-01 : f32
      %29 = vector.broadcast %cst_22 : f32 to vector<128x128xf32>
      %30 = arith.mulf %29, %28 : vector<128x128xf32>
      %31 = math.tanh %30 : vector<128x128xf32>
      %cst_23 = arith.constant 1.000000e+00 : f32
      %32 = vector.broadcast %cst_23 : f32 to vector<128x128xf32>
      %33 = arith.addf %31, %32 : vector<128x128xf32>
      %cst_24 = arith.constant 5.000000e-01 : f32
      %34 = vector.broadcast %cst_24 : f32 to vector<128x128xf32>
      %35 = arith.mulf %34, %33 : vector<128x128xf32>
      %c0_25 = arith.constant 0 : index
      %c0_26 = arith.constant 0 : index
      %36 = vector.load %arg7[%c0_25, %c0_26] : memref<8x128xbf16, #tpu.memory_space<vmem>>, vector<8x128xbf16>
      %37 = arith.truncf %35 : vector<128x128xf32> to vector<128x128xbf16>
      %cst_27 = arith.constant dense<0.000000e+00> : vector<8x128xf32>
      %38 = tpu.matmul %36, %37, %cst_27 {dimension_numbers = #tpu.dot_dimension_numbers<[1], [1], [0], [0], [0, 0, 1, 0], [], []>} : vector<8x128xbf16>, vector<128x128xbf16>, vector<8x128xf32> -> vector<8x128xf32>
      %39 = vector.extract_strided_slice %38 {offsets = [0, 0], sizes = [1, 128], strides = [1, 1]} : vector<8x128xf32> to vector<1x128xf32>
      %c0_28 = arith.constant 0 : index
      %c0_29 = arith.constant 0 : index
      %40 = vector.load %arg8[%c0_28, %c0_29] : memref<1x1xf32, #tpu.memory_space<vmem>>, vector<1x1xf32>
      %41 = vector.broadcast %40 : vector<1x1xf32> to vector<1x128xf32>
      %42 = arith.addf %39, %41 : vector<1x128xf32>
      %cst_30 = arith.constant 5.000000e-01 : f32
      %43 = vector.broadcast %cst_30 : f32 to vector<1x128xf32>
      %44 = arith.mulf %43, %42 : vector<1x128xf32>
      %45 = math.tanh %44 : vector<1x128xf32>
      %cst_31 = arith.constant 1.000000e+00 : f32
      %46 = vector.broadcast %cst_31 : f32 to vector<1x128xf32>
      %47 = arith.addf %45, %46 : vector<1x128xf32>
      %cst_32 = arith.constant 5.000000e-01 : f32
      %48 = vector.broadcast %cst_32 : f32 to vector<1x128xf32>
      %49 = arith.mulf %48, %47 : vector<1x128xf32>
      %c0_33 = arith.constant 0 : index
      %c0_34 = arith.constant 0 : index
      %50 = vector.load %arg9[%c0_33, %c0_34] : memref<1x128xf32, #tpu.memory_space<vmem>>, vector<1x128xf32>
      tpu.vector_store %arg9[%c0_33, %c0_34], %49 {strides = array<i32>} : memref<1x128xf32, #tpu.memory_space<vmem>>, vector<1x128xf32>,
    } else {
    }
    return
  }
  func.func @transform_0(%arg0: i32, %arg1: i32) -> (i32, i32) {
    %c0_i32 = arith.constant 0 : i32
    return %arg0, %arg1 : i32, i32
  }
  func.func @transform_1(%arg0: i32, %arg1: i32) -> (i32, i32) {
    %c0_i32 = arith.constant 0 : i32
    %c0_i32_0 = arith.constant 0 : i32
    return %arg1, %c0_i32 : i32, i32
  }
  func.func @transform_2(%arg0: i32, %arg1: i32) -> (i32, i32) {
    %c0_i32 = arith.constant 0 : i32
    %c0_i32_0 = arith.constant 0 : i32
    %c0_i32_1 = arith.constant 0 : i32
    return %c0_i32, %c0_i32_0 : i32, i32
  }
  func.func @transform_3(%arg0: i32, %arg1: i32) -> (i32, i32) {
    %c0_i32 = arith.constant 0 : i32
    %c0_i32_0 = arith.constant 0 : i32
    %c0_i32_1 = arith.constant 0 : i32
    return %c0_i32, %c0_i32_0 : i32, i32
  }
  func.func @transform_4(%arg0: i32, %arg1: i32) -> (i32, i32) {
    %c0_i32 = arith.constant 0 : i32
    %c0_i32_0 = arith.constant 0 : i32
    %c0_i32_1 = arith.constant 0 : i32
    return %c0_i32, %c0_i32_0 : i32, i32
  }
  func.func @transform_5(%arg0: i32, %arg1: i32) -> (i32, i32) {
    %c0_i32 = arith.constant 0 : i32
    %c0_i32_0 = arith.constant 0 : i32
    %c0_i32_1 = arith.constant 0 : i32
    return %c0_i32, %c0_i32_0 : i32, i32
  }
  func.func @transform_6(%arg0: i32, %arg1: i32) -> (i32, i32) {
    %c0_i32 = arith.constant 0 : i32
    %c0_i32_0 = arith.constant 0 : i32
    %c0_i32_1 = arith.constant 0 : i32
    return %c0_i32, %c0_i32_0 : i32, i32
  }
  func.func @transform_7(%arg0: i32, %arg1: i32) -> (i32, i32) {
    %c0_i32 = arith.constant 0 : i32
    %c0_i32_0 = arith.constant 0 : i32
    return %c0_i32, %arg0 : i32, i32
  }
}

</mosaic_0001>

<bundles_post_ra>
// kernel: tpu_custom_call.1
= control target key start
LH: loop header
LB: loop body
LE: loop exit
PB: predicated region body
PF: predicated region fallthrough
CT: control target
= control target key end

     0   :  { %s1140_s0 = inlined_call_operand.vmem [shape: bf16[128,32], index: 0, kind: input, shape index: {}]   ;;  %s1141_s1 = inlined_call_operand.vmem [shape: bf16[32,128], index: 1, kind: input, shape index: {}]   ;;  %s1142_s2 = inlined_call_operand.vmem [shape: f32[1,128], index: 2, kind: input, shape index: {}]   ;;  %s1143_s3 = inlined_call_operand.vmem [shape: bf16[128,128], index: 3, kind: input, shape index: {}]   ;;  %s1144_s4 = inlined_call_operand.vmem [shape: f32[1,128], index: 4, kind: input, shape index: {}]   ;;  %s1145_s5 = inlined_call_operand.vmem [shape: bf16[8,128], index: 5, kind: input, shape index: {}]   ;;  %s1146_s6 = inlined_call_operand.<no memory space> [shape: f32[1,1], index: 6, kind: input, shape index: {}]   ;;  %s1147_s7 = inlined_call_operand.hbm [shape: f32[1,128], index: 7, kind: output, shape index: {}]  }
   0x1   :  { %v12_v0 = vstv %s1146_s6 }
   0x2   :  { %13 = vst [vmem:[#allocation3] sm:$0x1] %v12_v0 }
   0x3   :  { %v857_v1 = vld [vmem:[%s1141_s1] sm:$0xff]   ;;  %v858_v2 = vld [vmem:[%s1141_s1 + $0x8] sm:$0xff]   ;;  %vm138_vm0 = vcmask 261120   ;;  %v861_v5 = vld [vmem:[%s1140_s0 + $0x10] sm:$0xff]  }
   0x4   :  { %780 = vmatprep.subr.bf16.mxu1 %v857_v1  ;;  %v859_v3 = vld [vmem:[%s1140_s0] sm:$0xff]   ;;  %v860_v4 = vld [vmem:[%s1140_s0 + $0x8] sm:$0xff]   ;;  %v862_v8 = vld [vmem:[%s1140_s0 + $0x18] sm:$0xff]  }
   0x5   :  { %781 = vmatpush3.bf16.msra.mxu1 %v857_v1  ;;  %784 = vmatprep.mubr.msk.bf16.mxu1 %vm138_vm0, %v859_v3  ;;  %v867_v6 = vld [vmem:[%s1143_s3] sm:$0xff]   ;;  %v868_v7 = vld [vmem:[%s1143_s3 + $0x8] sm:$0xff]  }
   0x6   :  { %782 = vmatprep.subr.bf16.mxu1 %v858_v2  ;;  %v863_v9 = vld [vmem:[%s1140_s0 + $0x20] sm:$0xff]  }
   0x9   :  { %783 = vmatpush3.bf16.msra.mxu1 %v858_v2 }
   0xa   :  { %800 = vmatprep.subr.bf16.mxu1 %v867_v6 }
   0xc   :  { %785 = vmatmul.mubr.msk.bf16.vlgmr.msra.gmra.mrb[0].mxu1 %vm138_vm0, %v860_v4 }
   0xd   :  { %788 = vmatprep.mubr.msk.bf16.mxu1 %vm138_vm0, %v861_v5  ;;  %801 = vmatpush3.bf16.msra.mxu1 %v867_v6 }
   0xe   :  { %802 = vmatprep.subr.bf16.mxu1 %v868_v7 }
   0xf   :  { %14 = vsyncpa [#allocation5], 0  ;;  %v864_v10 = vld [vmem:[%s1140_s0 + $0x28] sm:$0xff]   ;;  %v865_v11 = vld [vmem:[%s1140_s0 + $0x30] sm:$0xff]   ;;  %vm966_vm1 = vmmov 0   ;;  %s968_s14 = smov [#allocation4]  }
  0x10   :  { %v866_v12 = vld [vmem:[%s1140_s0 + $0x38] sm:$0xff]   ;;  %v869_v13 = vld [vmem:[%s1143_s3 + $0x10] sm:$0xff]   ;;  %v871_v15 = vld [vmem:[%s1143_s3 + $0x20] sm:$0xff]   ;;  %s709_s15 = sshll.u32 %s968_s14, 4  ;;  %s710_s15 = int_to_ptr.vmem [resolvable:$true] %s709_s15 }
  0x11   :  { %803 = vmatpush3.bf16.msra.mxu1 %v868_v7  ;;  %v870_v14 = vld [vmem:[%s1143_s3 + $0x18] sm:$0xff]   ;;  %v872_v16 = vld [vmem:[%s1143_s3 + $0x28] sm:$0xff]   ;;  %v873_v17 = vld [vmem:[%s1143_s3 + $0x30] sm:$0xff]   ;;  %s945_s16 = scalar_lea.vmem %s710_s15, 32  ;;  %p946_p1 = scmp.lt.s32.totalorder %s710_s15, %s710_s15 }
  0x12   :  { %804 = vmatprep.subr.bf16.mxu1 %v869_v13  ;;  %v874_v18 = vld [vmem:[%s1143_s3 + $0x38] sm:$0xff]   ;;  %v1077_v19 = vld [vmem:[%s1142_s2] ss:$0 sm:$0xff] }
  0x14   :  { %789 = vmatmul.mubr.msk.bf16.gmra.mrb[4].mxu1 %vm138_vm0, %v862_v8 }
  0x15   :  { %792 = vmatprep.mubr.msk.bf16.mxu1 %vm138_vm0, %v863_v9  ;;  %805 = vmatpush3.bf16.msra.mxu1 %v869_v13 }
  0x16   :  { %806 = vmatprep.subr.bf16.mxu1 %v870_v14 }
  0x19   :  { %807 = vmatpush3.bf16.msra.mxu1 %v870_v14 }
  0x1a   :  { %808 = vmatprep.subr.bf16.mxu1 %v871_v15 }
  0x1c   :  { %793 = vmatmul.mubr.msk.bf16.gmra.mrb[8].mxu1 %vm138_vm0, %v864_v10 }
  0x1d   :  { %796 = vmatprep.mubr.msk.bf16.mxu1 %vm138_vm0, %v865_v11  ;;  %809 = vmatpush3.bf16.msra.mxu1 %v871_v15 }
  0x1e   :  { %810 = vmatprep.subr.bf16.mxu1 %v872_v16 }
  0x21   :  { %811 = vmatpush3.bf16.msra.mxu1 %v872_v16 }
  0x22   :  { %812 = vmatprep.subr.bf16.mxu1 %v873_v17 }
  0x24   :  { %797 = vmatmul.mubr.msk.bf16.gmra.mrb[12].mxu1 %vm138_vm0, %v866_v12 }
  0x25   :  { %813 = vmatpush3.bf16.msra.mxu1 %v873_v17 }
  0x26   :  { %814 = vmatprep.subr.bf16.mxu1 %v874_v18 }
  0x29   :  { %815 = vmatpush3.bf16.msra.mxu1 %v874_v18 }
  0xdf   :  { %v786_v20 = vpop.f32.mrb[0].mxu1 }
  0xe0   :  { %v320_v21 = vadd.f32 %v786_v20, %v1077_v19  ;;  %v197_v22 = vpop.f32.mrb[1].mxu1 }
  0xe1   :  { %v318_v23 = vadd.f32 %v1077_v19, %v197_v22  ;;  %v787_v24 = vpop.f32.mrb[2].mxu1 }
  0xe2   :  { %v336_v25 = vmul.f32 0.5, %v320_v21  ;;  %v321_v26 = vadd.f32 %v787_v24, %v1077_v19  ;;  %v200_v27 = vpop.f32.mrb[3].mxu1 }
  0xe3   :  { %v334_v28 = vmul.f32 0.5, %v318_v23  ;;  %v319_v29 = vadd.f32 %v1077_v19, %v200_v27 }
  0xe4   :  { %875 = vtanh.f32 %v336_v25  ;;  %v337_v30 = vmul.f32 0.5, %v321_v26 }
  0xe5   :  { %877 = vtanh.f32 %v334_v28  ;;  %v335_v31 = vmul.f32 0.5, %v319_v29 }
  0xe6   :  { %879 = vtanh.f32 %v337_v30 }
  0xe7   :  { %881 = vtanh.f32 %v335_v31  ;;  %v790_v32 = vpop.f32.mrb[4].mxu1 }
  0xe8   :  { %v324_v33 = vadd.f32 %v790_v32, %v1077_v19  ;;  %v213_v34 = vpop.f32.mrb[5].mxu1 }
  0xe9   :  { %v322_v35 = vadd.f32 %v1077_v19, %v213_v34  ;;  %v791_v36 = vpop.f32.mrb[6].mxu1 }
  0xea   :  { %v340_v37 = vmul.f32 0.5, %v324_v33  ;;  %v325_v38 = vadd.f32 %v791_v36, %v1077_v19  ;;  %v216_v39 = vpop.f32.mrb[7].mxu1 }
  0xeb   :  { %v338_v40 = vmul.f32 0.5, %v322_v35  ;;  %v323_v41 = vadd.f32 %v1077_v19, %v216_v39 }
  0xec   :  { %883 = vtanh.f32 %v340_v37  ;;  %v341_v42 = vmul.f32 0.5, %v325_v38 }
  0xed   :  { %885 = vtanh.f32 %v338_v40  ;;  %v339_v43 = vmul.f32 0.5, %v323_v41 }
  0xee   :  { %v876_v44 = vpop.eup %875  ;;  %887 = vtanh.f32 %v341_v42 }
  0xef   :  { %v878_v45 = vpop.eup %877  ;;  %v368_v46 = vadd.f32 1.0, %v876_v44  ;;  %889 = vtanh.f32 %v339_v43  ;;  %v794_v47 = vpop.f32.mrb[8].mxu1 }
  0xf0   :  { %v880_v48 = vpop.eup %879  ;;  %v366_v49 = vadd.f32 1.0, %v878_v45  ;;  %v328_v50 = vadd.f32 %v794_v47, %v1077_v19  ;;  %v229_v51 = vpop.f32.mrb[9].mxu1 }
  0xf1   :  { %v882_v52 = vpop.eup %881  ;;  %v369_v53 = vadd.f32 1.0, %v880_v48  ;;  %v326_v54 = vadd.f32 %v1077_v19, %v229_v51  ;;  %v795_v55 = vpop.f32.mrb[10].mxu1  ;;  %v384_v60 = vmul.f32 0.5, %v368_v46 }
  0xf2   :  { %v367_v56 = vadd.f32 1.0, %v882_v52  ;;  %v344_v57 = vmul.f32 0.5, %v328_v50  ;;  %v329_v58 = vadd.f32 %v795_v55, %v1077_v19  ;;  %v232_v59 = vpop.f32.mrb[11].mxu1  ;;  %v382_v0 = vmul.f32 0.5, %v366_v49 }
  0xf3   :  { %v385_v61 = vmul.f32 0.5, %v369_v53  ;;  %v342_v62 = vmul.f32 0.5, %v326_v54  ;;  %v327_v63 = vadd.f32 %v1077_v19, %v232_v59 }
  0xf4   :  { %v383_v1 = vmul.f32 0.5, %v367_v56  ;;  %891 = vtanh.f32 %v344_v57  ;;  %v345_v2 = vmul.f32 0.5, %v329_v58 }
  0xf5   :  { %v399_v3 = vpack.c.bf16 %v385_v61, %v384_v60  ;;  %893 = vtanh.f32 %v342_v62  ;;  %v343_v4 = vmul.f32 0.5, %v327_v63  ;;  %v965_v60 = vmov 0.0   ;;  %v687_v61 = vld [vmem:[#allocation3] sm:$0x1] }
  0xf6   :  { %v884_v5 = vpop.eup %883  ;;  %v398_v6 = vpack.c.bf16 %v383_v1, %v382_v0  ;;  %895 = vtanh.f32 %v345_v2  ;;  %832 = vmatprep.subr.bf16.mxu0 %v965_v60  ;;  %848 = vmatprep.mubr.msk.bf16.mxu0 %vm966_vm1, %v965_v60  ;;  %v967_v62 = vmov 0   ;;  %v1100_v63 = vld [vmem:[%s1144_s4] ss:$0 sm:$0xff] }
  0xf7   :  { %v886_v7 = vpop.eup %885  ;;  %v372_v8 = vadd.f32 1.0, %v884_v5  ;;  %897 = vtanh.f32 %v343_v4  ;;  %v798_v9 = vpop.f32.mrb[12].mxu1  ;;  %856 = vset.pattern.permute.xlu0 %v967_v62 }
  0xf8   :  { %v888_v10 = vpop.eup %887  ;;  %v370_v11 = vadd.f32 1.0, %v886_v7  ;;  %816 = vmatprep.mubr.bf16.mxu1 %v398_v6  ;;  %v332_v12 = vadd.f32 %v798_v9, %v1077_v19  ;;  %v245_v13 = vpop.f32.mrb[13].mxu1  ;;  %690 = vperm.xlu0 %856, %v687_v61  }
  0xf9   :  { %v890_v14 = vpop.eup %889  ;;  %v388_v15 = vmul.f32 0.5, %v372_v8  ;;  %v373_v16 = vadd.f32 1.0, %v888_v10  ;;  %817 = vmatmul.mubr.bf16.vlgmr.msra.gmra.mrb[16].mxu1 %v399_v3  ;;  %v330_v17 = vadd.f32 %v1077_v19, %v245_v13  ;;  %v799_v18 = vpop.f32.mrb[14].mxu1 }
  0xfa   :  { %v386_v20 = vmul.f32 0.5, %v370_v11  ;;  %v371_v21 = vadd.f32 1.0, %v890_v14  ;;  %v348_v22 = vmul.f32 0.5, %v332_v12  ;;  %v333_v23 = vadd.f32 %v799_v18, %v1077_v19  ;;  %v248_v24 = vpop.f32.mrb[15].mxu1 }
  0xfb   :  { %v389_v25 = vmul.f32 0.5, %v373_v16  ;;  %v346_v26 = vmul.f32 0.5, %v330_v17  ;;  %v331_v27 = vadd.f32 %v1077_v19, %v248_v24 }
  0xfc   :  { %v387_v28 = vmul.f32 0.5, %v371_v21  ;;  %899 = vtanh.f32 %v348_v22  ;;  %v349_v29 = vmul.f32 0.5, %v333_v23 }
  0xfd   :  { %v401_v30 = vpack.c.bf16 %v389_v25, %v388_v15  ;;  %901 = vtanh.f32 %v346_v26  ;;  %v347_v31 = vmul.f32 0.5, %v331_v27 }
  0xfe   :  { %v892_v32 = vpop.eup %891  ;;  %v400_v33 = vpack.c.bf16 %v387_v28, %v386_v20  ;;  %903 = vtanh.f32 %v349_v29 }
  0xff   :  { %v894_v34 = vpop.eup %893  ;;  %v376_v35 = vadd.f32 1.0, %v892_v32  ;;  %905 = vtanh.f32 %v347_v31 }
 0x100   :  { %v896_v36 = vpop.eup %895  ;;  %v374_v37 = vadd.f32 1.0, %v894_v34  ;;  %820 = vmatprep.mubr.bf16.mxu1 %v400_v33 }
 0x101   :  { %v898_v38 = vpop.eup %897  ;;  %v392_v39 = vmul.f32 0.5, %v376_v35  ;;  %v377_v40 = vadd.f32 1.0, %v896_v36  ;;  %821 = vmatmul.mubr.bf16.gmra.mrb[20].mxu1 %v401_v30 }
 0x102   :  { %v390_v19 = vmul.f32 0.5, %v374_v37  ;;  %v375_v41 = vadd.f32 1.0, %v898_v38 }
 0x103   :  { %v393_v42 = vmul.f32 0.5, %v377_v40 }
 0x104   :  { %v391_v43 = vmul.f32 0.5, %v375_v41 }
 0x105   :  { %v403_v44 = vpack.c.bf16 %v393_v42, %v392_v39 }
 0x106   :  { %v900_v45 = vpop.eup %899  ;;  %v402_v46 = vpack.c.bf16 %v391_v43, %v390_v19 }
 0x107   :  { %v902_v47 = vpop.eup %901  ;;  %v380_v48 = vadd.f32 1.0, %v900_v45 }
 0x108   :  { %v904_v49 = vpop.eup %903  ;;  %v378_v50 = vadd.f32 1.0, %v902_v47  ;;  %824 = vmatprep.mubr.bf16.mxu1 %v402_v46 }
 0x109   :  { %v906_v51 = vpop.eup %905  ;;  %v396_v52 = vmul.f32 0.5, %v380_v48  ;;  %v381_v53 = vadd.f32 1.0, %v904_v49  ;;  %825 = vmatmul.mubr.bf16.gmra.mrb[24].mxu1 %v403_v44 }
 0x10a   :  { %v394_v54 = vmul.f32 0.5, %v378_v50  ;;  %v379_v55 = vadd.f32 1.0, %v906_v51 }
 0x10b   :  { %v397_v56 = vmul.f32 0.5, %v381_v53 }
 0x10c   :  { %v395_v57 = vmul.f32 0.5, %v379_v55 }
 0x10d   :  { %v405_v58 = vpack.c.bf16 %v397_v56, %v396_v52 }
 0x10e   :  { %v404_v59 = vpack.c.bf16 %v395_v57, %v394_v54 }
 0x110   :  { %828 = vmatprep.mubr.bf16.mxu1 %v404_v59 }
 0x111   :  { %829 = vmatmul.mubr.bf16.gmra.mrb[28].mxu1 %v405_v58 }
 0x1cc   :  { %v818_v0 = vpop.f32.mrb[16].mxu1 }
 0x1cd   :  { %v520_v1 = vadd.f32 %v818_v0, %v1100_v63  ;;  %v511_v2 = vpop.f32.mrb[17].mxu1 }
 0x1ce   :  { %v512_v3 = vadd.f32 %v1100_v63, %v511_v2  ;;  %v819_v4 = vpop.f32.mrb[18].mxu1 }
 0x1cf   :  { %v576_v5 = vmul.f32 0.5, %v520_v1  ;;  %v523_v6 = vadd.f32 %v819_v4, %v1100_v63  ;;  %v514_v7 = vpop.f32.mrb[19].mxu1 }
 0x1d0   :  { %v574_v8 = vmul.f32 0.5, %v512_v3  ;;  %v515_v9 = vadd.f32 %v1100_v63, %v514_v7 }
 0x1d1   :  { %907 = vtanh.f32 %v576_v5  ;;  %v577_v10 = vmul.f32 0.5, %v523_v6 }
 0x1d2   :  { %909 = vtanh.f32 %v574_v8  ;;  %v575_v11 = vmul.f32 0.5, %v515_v9 }
 0x1d3   :  { %911 = vtanh.f32 %v577_v10 }
 0x1d4   :  { %913 = vtanh.f32 %v575_v11  ;;  %v822_v12 = vpop.f32.mrb[20].mxu1 }
 0x1d5   :  { %v536_v13 = vadd.f32 %v822_v12, %v1100_v63  ;;  %v527_v14 = vpop.f32.mrb[21].mxu1 }
 0x1d6   :  { %v528_v15 = vadd.f32 %v1100_v63, %v527_v14  ;;  %v823_v16 = vpop.f32.mrb[22].mxu1 }
 0x1d7   :  { %v580_v17 = vmul.f32 0.5, %v536_v13  ;;  %v539_v18 = vadd.f32 %v823_v16, %v1100_v63  ;;  %v530_v20 = vpop.f32.mrb[23].mxu1 }
 0x1d8   :  { %v578_v21 = vmul.f32 0.5, %v528_v15  ;;  %v531_v22 = vadd.f32 %v1100_v63, %v530_v20 }
 0x1d9   :  { %915 = vtanh.f32 %v580_v17  ;;  %v581_v23 = vmul.f32 0.5, %v539_v18 }
 0x1da   :  { %917 = vtanh.f32 %v578_v21  ;;  %v579_v24 = vmul.f32 0.5, %v531_v22 }
 0x1db   :  { %v908_v25 = vpop.eup %907  ;;  %919 = vtanh.f32 %v581_v23 }
 0x1dc   :  { %v910_v26 = vpop.eup %909  ;;  %v608_v27 = vadd.f32 1.0, %v908_v25  ;;  %921 = vtanh.f32 %v579_v24  ;;  %v826_v28 = vpop.f32.mrb[24].mxu1 }
 0x1dd   :  { %v912_v29 = vpop.eup %911  ;;  %v552_v30 = vadd.f32 %v826_v28, %v1100_v63  ;;  %v606_v31 = vadd.f32 1.0, %v910_v26  ;;  %v543_v32 = vpop.f32.mrb[25].mxu1 }
 0x1de   :  { %v914_v33 = vpop.eup %913  ;;  %v609_v34 = vadd.f32 1.0, %v912_v29  ;;  %v544_v35 = vadd.f32 %v1100_v63, %v543_v32  ;;  %v827_v36 = vpop.f32.mrb[26].mxu1  ;;  %v624_v19 = vmul.f32 0.5, %v608_v27 }
 0x1df   :  { %v584_v37 = vmul.f32 0.5, %v552_v30  ;;  %v607_v38 = vadd.f32 1.0, %v914_v33  ;;  %v555_v39 = vadd.f32 %v827_v36, %v1100_v63  ;;  %v546_v40 = vpop.f32.mrb[27].mxu1  ;;  %v622_v44 = vmul.f32 0.5, %v606_v31 }
 0x1e0   :  { %v625_v41 = vmul.f32 0.5, %v609_v34  ;;  %v582_v42 = vmul.f32 0.5, %v544_v35  ;;  %v547_v43 = vadd.f32 %v1100_v63, %v546_v40 }
 0x1e1   :  { %923 = vtanh.f32 %v584_v37  ;;  %v623_v45 = vmul.f32 0.5, %v607_v38  ;;  %v585_v46 = vmul.f32 0.5, %v555_v39 }
 0x1e2   :  { %925 = vtanh.f32 %v582_v42  ;;  %v583_v47 = vmul.f32 0.5, %v547_v43  ;;  %v640_v48 = vpack.c.bf16 %v625_v41, %v624_v19  ;;  %v638_v41 = vld [vmem:[%s1145_s5] sm:$0xf]  ;;  %v693_v42 = vlaneseq  ;;  %s941_s5 = scalar_lea.vmem %s710_s15, 16 }
 0x1e3   :  { %v916_v49 = vpop.eup %915  ;;  %v639_v50 = vpack.c.bf16 %v623_v45, %v622_v44  ;;  %927 = vtanh.f32 %v585_v46  ;;  %v691_v45 = vpop.permute.xlu0 %690  ;;  %p942_p0 = scmp.ne.s32.totalorder %s710_s15, %s941_s5  ;;  %p947_p2 = scmp.lt.s32.totalorder %s945_s16, %s941_s5 }
 0x1e4   :  { %v918_v51 = vpop.eup %917  ;;  %v612_v52 = vadd.f32 1.0, %v916_v49  ;;  %929 = vtanh.f32 %v583_v47  ;;  %v830_v53 = vpop.f32.mrb[28].mxu1  ;;  %v694_v43 = vshrl.u32 %v693_v42, 7 }
 0x1e5   :  { %v920_v54 = vpop.eup %919  ;;  %v610_v55 = vadd.f32 1.0, %v918_v51  ;;  %833 = vmatpush3.bf16.xpose.msra.mxu0 %v639_v50  ;;  %v568_v56 = vadd.f32 %v830_v53, %v1100_v63  ;;  %v559_v57 = vpop.f32.mrb[29].mxu1  ;;  %p948_p3 = por %p947_p2, %p946_p1 }
 0x1e6   :  { %v922_v58 = vpop.eup %921  ;;  %v628_v59 = vmul.f32 0.5, %v612_v52  ;;  %v613_v61 = vadd.f32 1.0, %v920_v54  ;;  %834 = vmatprep.subr.bf16.mxu0 %v965_v60  ;;  %v560_v62 = vadd.f32 %v1100_v63, %v559_v57  ;;  %v831_v0 = vpop.f32.mrb[30].mxu1  ;;  %v695_v44 = vsub.s32 0, %v694_v43 }
 0x1e7   :  { %v626_v1 = vmul.f32 0.5, %v610_v55  ;;  %v611_v2 = vadd.f32 1.0, %v922_v58  ;;  %v588_v3 = vmul.f32 0.5, %v568_v56  ;;  %v571_v4 = vadd.f32 %v831_v0, %v1100_v63  ;;  %v562_v5 = vpop.f32.mrb[31].mxu1  ;;  %p949_p4 = pnand %p948_p3, %p942_p0 }
 0x1e8   :  { %v629_v6 = vmul.f32 0.5, %v613_v61  ;;  %v586_v7 = vmul.f32 0.5, %v560_v62  ;;  %v563_v8 = vadd.f32 %v1100_v63, %v562_v5  ;;  %v696_v46 = vrot.slane %v691_v45, %v695_v44 }
 0x1e9   :  { %v627_v9 = vmul.f32 0.5, %v611_v2  ;;  %931 = vtanh.f32 %v588_v3  ;;  %v589_v10 = vmul.f32 0.5, %v571_v4 }
 0x1ea   :  { %933 = vtanh.f32 %v586_v7  ;;  %v587_v11 = vmul.f32 0.5, %v563_v8  ;;  %v642_v12 = vpack.c.bf16 %v629_v6, %v628_v59 }
 0x1eb   :  { %v924_v13 = vpop.eup %923  ;;  %v641_v14 = vpack.c.bf16 %v627_v9, %v626_v1  ;;  %935 = vtanh.f32 %v589_v10 }
 0x1ec   :  { %v926_v15 = vpop.eup %925  ;;  %v616_v16 = vadd.f32 1.0, %v924_v13  ;;  %937 = vtanh.f32 %v587_v11 }
 0x1ed   :  { %v928_v17 = vpop.eup %927  ;;  %v614_v18 = vadd.f32 1.0, %v926_v15  ;;  %835 = vmatpush3.bf16.xpose.msra.mxu0 %v640_v48 }
 0x1ee   :  { %v930_v20 = vpop.eup %929  ;;  %v632_v21 = vmul.f32 0.5, %v616_v16  ;;  %v617_v22 = vadd.f32 1.0, %v928_v17  ;;  %836 = vmatprep.subr.bf16.mxu0 %v965_v60 }
 0x1ef   :  { %v630_v63 = vmul.f32 0.5, %v614_v18  ;;  %v615_v23 = vadd.f32 1.0, %v930_v20 }
 0x1f0   :  { %v633_v24 = vmul.f32 0.5, %v617_v22 }
 0x1f1   :  { %v631_v25 = vmul.f32 0.5, %v615_v23 }
 0x1f2   :  { %v644_v26 = vpack.c.bf16 %v633_v24, %v632_v21 }
 0x1f3   :  { %v932_v27 = vpop.eup %931  ;;  %v643_v28 = vpack.c.bf16 %v631_v25, %v630_v63 }
 0x1f4   :  { %v934_v29 = vpop.eup %933  ;;  %v620_v30 = vadd.f32 1.0, %v932_v27 }
 0x1f5   :  { %v936_v31 = vpop.eup %935  ;;  %837 = vmatpush3.bf16.xpose.msra.mxu0 %v641_v14  ;;  %v618_v32 = vadd.f32 1.0, %v934_v29 }
 0x1f6   :  { %v938_v33 = vpop.eup %937  ;;  %v636_v34 = vmul.f32 0.5, %v620_v30  ;;  %v621_v35 = vadd.f32 1.0, %v936_v31  ;;  %838 = vmatprep.subr.bf16.mxu0 %v965_v60 }
 0x1f7   :  { %v634_v36 = vmul.f32 0.5, %v618_v32  ;;  %v619_v37 = vadd.f32 1.0, %v938_v33 }
 0x1f8   :  { %v637_v38 = vmul.f32 0.5, %v621_v35 }
 0x1f9   :  { %v635_v39 = vmul.f32 0.5, %v619_v37 }
 0x1fa   :  { %v646_v40 = vpack.c.bf16 %v637_v38, %v636_v34 }
 0x1fb   :  { %v645_v19 = vpack.c.bf16 %v635_v39, %v634_v36 }
 0x1fd   :  { %839 = vmatpush3.bf16.xpose.msra.mxu0 %v642_v12 }
 0x1fe   :  { %840 = vmatprep.subr.bf16.mxu0 %v965_v60 }
 0x205   :  { %841 = vmatpush3.bf16.xpose.msra.mxu0 %v643_v28 }
 0x206   :  { %842 = vmatprep.subr.bf16.mxu0 %v965_v60 }
 0x20d   :  { %843 = vmatpush3.bf16.xpose.msra.mxu0 %v644_v26 }
 0x20e   :  { %844 = vmatprep.subr.bf16.mxu0 %v965_v60 }
 0x215   :  { %845 = vmatpush3.bf16.xpose.msra.mxu0 %v645_v19 }
 0x216   :  { %846 = vmatprep.subr.bf16.mxu0 %v965_v60 }
 0x21d   :  { %847 = vmatpush3.bf16.xpose.msra.mxu0 %v646_v40 }
 0x224   :  { %849 = vmatmul.mubr.bf16.vlgmr.msra.gmra.mrb[0].mxu0 %v638_v41 }
 0x2f7   :  { %v681_v47 = vpop.f32.mrb[0].mxu0 }
 0x2f8   :  { %v697_v48 = vadd.f32 %v696_v46, %v681_v47  ;;  %v850_v49 = vpop.f32.mrb[1].mxu0 }
 0x2f9   :  { %v684_v50 = vpop.f32.mrb[2].mxu0 }
 0x2fa   :  { %v698_v51 = vmul.f32 0.5, %v697_v48  ;;  %v851_v52 = vpop.f32.mrb[3].mxu0 }
 0x2fc   :  { %939 = vtanh.f32 %v698_v51 }
 0x306   :  { %v940_v53 = vpop.eup %939 }
 0x307   :  { %v700_v60 = vadd.f32 1.0, %v940_v53 }
 0x309   :  { %v701_v54 = vmul.f32 0.5, %v700_v60 }
 0x30b   :  { %702 = vst [vmem:[#allocation4] sm:$0x1] %v701_v54 }
 0x30c   :  { %952 = shalt.err (!%p949_p4)
}
 0x30d   :  { %s953_s19 = scalar_lea.hbm %s1147_s7, 16 }
 0x30e   :  { %p954_p5 = scmp.ne.s32.totalorder %s1147_s7, %s953_s19  ;;  %p957_p6 = scmp.lt.u32.totalorder %s953_s19, %s1147_s7 }
 0x310   :  { %p959_p7 = pnand %p957_p6, %p954_p5 }
 0x312   :  { %962 = shalt.err (!%p959_p7)
}
 0x313   :  { %712 = dma.vmem_to_hbm [thread:$0]  %s710_s15, 16, %s1147_s7, [#allocation5]  }
 0x314   :  { %963 = dma.done.wait [#allocation5], 16  }
 0x315   :  { %964 = vsyncadd [#allocation5], 4294967280 }
 0x316   :  { %716 = vsyncpa [#allocation5], 1 }

</bundles_post_ra>
